<compile_context>
chip_gen: v5e
topology: v5e:2x2
jax: 0.10.0
libtpu: 0.0.40
codegen_flags: <defaults>
</compile_context>

<pallas_src>
import functools

import jax
import jax.numpy as jnp
from jax import lax
from jax.experimental import pallas as pl
from jax.experimental.pallas import tpu as pltpu


def _lora_kernel(x_ref, at_ref, b_ref, o_ref):
    """y = x + (x @ A) @ B with the rank-r update as unrolled VPU/XLU passes.

    at_ref holds A^T with shape (r, D) and b_ref holds B with shape (r, D),
    both lane-dense.  For each (static) k:
        coeff_k = sum_d x[:, d] * A^T[k, d]     # lane reduction (XLU)
        update += coeff_k * B[k, :]             # broadcast FMA   (VPU)
    """
    x = x_ref[...]                               # (tm, D), native dtype
    xf = x.astype(jnp.float32)
    r = at_ref.shape[0]
    acc = jnp.zeros(x.shape, jnp.float32)
    for k in range(r):                           # rank is tiny & static -> unrolled
        a_row = at_ref[k:k + 1, :].astype(jnp.float32)   # (1, D) lane-dense
        b_row = b_ref[k:k + 1, :].astype(jnp.float32)    # (1, D) lane-dense
        coeff = jnp.sum(xf * a_row, axis=-1, keepdims=True)   # (tm, 1), f32 acc
        acc = acc + coeff * b_row                # (tm, D)
    # Residual add in the native dtype (update accumulated in f32).
    o_ref[...] = x + acc.astype(x.dtype)


def _choose_row_tile(M, D, itemsize, sublane):
    # x and y are each double-buffered by the pipeline: 4 resident (tm, D)
    # tiles.  40 MiB budget is safe across v5e/v6e (128 MiB VMEM) and v7x
    # (64 MiB VMEM) while staying far above the ~0.35 us/step overhead regime.
    budget = 40 * 1024 * 1024
    tm = budget // (4 * D * itemsize)
    tm = min(tm, 1024)                    # diminishing returns past ~1K rows
    tm = min(tm, M)
    if M >= 2 * sublane:                  # keep >=2 grid steps so both v7x TCs get work
        tm = min(tm, pl.cdiv(M, 2))
    tm = max(sublane, (tm // sublane) * sublane)
    return int(tm)


def lora_forward(x, A, B, *, tm=None, donate_x=False):
    """Computes x + (x @ A) @ B.  A: (D, r), B: (r, D), x: (M, D)."""
    M, D = x.shape
    r = A.shape[1]
    assert A.shape == (D, r) and B.shape == (r, D)

    itemsize = jnp.dtype(x.dtype).itemsize
    sublane = 8 * (4 // itemsize)         # 8 rows f32, 16 bf16, 32 int8
    if tm is None:
        tm = _choose_row_tile(M, D, itemsize, sublane)

    # Pad ragged batches up to a tile multiple; sliced off after the call.
    M_pad = pl.cdiv(M, tm) * tm
    x_pad = x if M_pad == M else jnp.pad(x, ((0, M_pad - M), (0, 0)))

    A_t = A.T                              # (r, D): lane-dense layout for the kernel

    grid = (M_pad // tm,)

    # Explicit scoped-VMEM limit: what this kernel actually needs (+ slack),
    # capped at 48 MiB so it also fits v7x's 64 MiB physical VMEM.
    vmem_needed = 4 * tm * D * itemsize + 4 * r * D * itemsize + (2 << 20)
    vmem_limit = int(min(max(vmem_needed, 16 << 20), 48 << 20))

    cost = pl.CostEstimate(
        flops=4 * M_pad * D * r,
        transcendentals=0,
        bytes_accessed=2 * M_pad * D * itemsize + 2 * r * D * itemsize,
    )

    call = pl.pallas_call(
        _lora_kernel,
        out_shape=jax.ShapeDtypeStruct((M_pad, D), x.dtype),
        grid_spec=pl.GridSpec(
            grid=grid,
            in_specs=[
                pl.BlockSpec((tm, D), lambda i: (i, 0)),   # x row tile, full D
                pl.BlockSpec((r, D), lambda i: (0, 0)),    # A^T resident
                pl.BlockSpec((r, D), lambda i: (0, 0)),    # B   resident
            ],
            out_specs=pl.BlockSpec((tm, D), lambda i: (i, 0)),
        ),
        compiler_params=pltpu.CompilerParams(
            dimension_semantics=("parallel",),
            vmem_limit_bytes=vmem_limit,
        ),
        cost_estimate=cost,
        # Only alias x->y when the caller explicitly allows overwriting x
        # (the PyTorch module returns a fresh tensor, so default is off).
        input_output_aliases=({0: 0} if donate_x else {}),
    )
    out = call(x_pad, A_t, B)
    return out[:M] if M_pad != M else out


if __name__ == "__main__":
    # Small shapes consistent with the module; ragged batch exercises padding,
    # D=128 keeps the output lane-dense.
    batch, input_dim, rank = 10, 128, 4

    key = jax.random.PRNGKey(0)
    kx, ka, kb = jax.random.split(key, 3)
    x = jax.random.normal(kx, (batch, input_dim), dtype=jnp.float32)
    A = jax.random.normal(ka, (input_dim, rank), dtype=jnp.float32)
    B = jax.random.normal(kb, (rank, input_dim), dtype=jnp.float32)

    # High-precision reference (avoid TPU default bf16 matmul precision).
    ref = x + jnp.matmul(
        jnp.matmul(x, A, precision=lax.Precision.HIGHEST),
        B, precision=lax.Precision.HIGHEST)

    out = jax.block_until_ready(lora_forward(x, A, B))

    assert out.shape == (batch, input_dim)
    assert jnp.allclose(out, ref, atol=1e-4, rtol=1e-4), "mismatch vs reference"

    print("KERNEL_OK")
</pallas_src>

<mosaic_0001>
module attributes {stable_mosaic.version = 11 : i64} {
  func.func @_lora_kernel(%arg0: i32, %arg1: memref<8x128xf32, #tpu.memory_space<vmem>>, %arg2: memref<4x128xf32, #tpu.memory_space<vmem>>, %arg3: memref<4x128xf32, #tpu.memory_space<vmem>>, %arg4: memref<8x128xf32, #tpu.memory_space<vmem>>) attributes {dimension_semantics = [#tpu.dimension_semantics<parallel>], iteration_bounds = array<i64: 2>, scalar_prefetch = 0 : i64, scratch_operands = 0 : i64, tpu.core_type = #tpu.core_type<tc>, window_params = [{transform_indices = @transform_0, window_bounds = array<i64: 8, 128>}, {pipeline_mode = #tpu.pipeline_mode<synchronous>, transform_indices = @transform_1, window_bounds = array<i64: 4, 128>}, {pipeline_mode = #tpu.pipeline_mode<synchronous>, transform_indices = @transform_2, window_bounds = array<i64: 4, 128>}, {transform_indices = @transform_3, window_bounds = array<i64: 8, 128>}]} {
    %c0 = arith.constant 0 : index
    %c0_0 = arith.constant 0 : index
    %0 = vector.load %arg1[%c0, %c0_0] : memref<8x128xf32, #tpu.memory_space<vmem>>, vector<8x128xf32>
    %cst = arith.constant 0.000000e+00 : f32
    %1 = vector.broadcast %cst : f32 to vector<8x128xf32>
    %c0_1 = arith.constant 0 : index
    %c0_2 = arith.constant 0 : index
    %2 = vector.load %arg2[%c0_1, %c0_2] : memref<4x128xf32, #tpu.memory_space<vmem>>, vector<1x128xf32>
    %c0_3 = arith.constant 0 : index
    %c0_4 = arith.constant 0 : index
    %3 = vector.load %arg3[%c0_3, %c0_4] : memref<4x128xf32, #tpu.memory_space<vmem>>, vector<1x128xf32>
    %4 = vector.broadcast %2 : vector<1x128xf32> to vector<8x128xf32>
    %5 = arith.mulf %0, %4 : vector<8x128xf32>
    %cst_5 = arith.constant dense<0.000000e+00> : vector<8xf32>
    %6 = vector.multi_reduction <add>, %5, %cst_5 [1] : vector<8x128xf32> to vector<8xf32>
    %7 = vector.shape_cast %6 : vector<8xf32> to vector<8x1xf32>
    %8 = vector.broadcast %7 : vector<8x1xf32> to vector<8x128xf32>
    %9 = vector.broadcast %3 : vector<1x128xf32> to vector<8x128xf32>
    %10 = arith.mulf %8, %9 : vector<8x128xf32>
    %11 = arith.addf %1, %10 : vector<8x128xf32>
    %c1 = arith.constant 1 : index
    %c0_6 = arith.constant 0 : index
    %12 = vector.load %arg2[%c1, %c0_6] : memref<4x128xf32, #tpu.memory_space<vmem>>, vector<1x128xf32>
    %c1_7 = arith.constant 1 : index
    %c0_8 = arith.constant 0 : index
    %13 = vector.load %arg3[%c1_7, %c0_8] : memref<4x128xf32, #tpu.memory_space<vmem>>, vector<1x128xf32>
    %14 = vector.broadcast %12 : vector<1x128xf32> to vector<8x128xf32>
    %15 = arith.mulf %0, %14 : vector<8x128xf32>
    %cst_9 = arith.constant dense<0.000000e+00> : vector<8xf32>
    %16 = vector.multi_reduction <add>, %15, %cst_9 [1] : vector<8x128xf32> to vector<8xf32>
    %17 = vector.shape_cast %16 : vector<8xf32> to vector<8x1xf32>
    %18 = vector.broadcast %17 : vector<8x1xf32> to vector<8x128xf32>
    %19 = vector.broadcast %13 : vector<1x128xf32> to vector<8x128xf32>
    %20 = arith.mulf %18, %19 : vector<8x128xf32>
    %21 = arith.addf %11, %20 : vector<8x128xf32>
    %c2 = arith.constant 2 : index
    %c0_10 = arith.constant 0 : index
    %22 = vector.load %arg2[%c2, %c0_10] : memref<4x128xf32, #tpu.memory_space<vmem>>, vector<1x128xf32>
    %c2_11 = arith.constant 2 : index
    %c0_12 = arith.constant 0 : index
    %23 = vector.load %arg3[%c2_11, %c0_12] : memref<4x128xf32, #tpu.memory_space<vmem>>, vector<1x128xf32>
    %24 = vector.broadcast %22 : vector<1x128xf32> to vector<8x128xf32>
    %25 = arith.mulf %0, %24 : vector<8x128xf32>
    %cst_13 = arith.constant dense<0.000000e+00> : vector<8xf32>
    %26 = vector.multi_reduction <add>, %25, %cst_13 [1] : vector<8x128xf32> to vector<8xf32>
    %27 = vector.shape_cast %26 : vector<8xf32> to vector<8x1xf32>
    %28 = vector.broadcast %27 : vector<8x1xf32> to vector<8x128xf32>
    %29 = vector.broadcast %23 : vector<1x128xf32> to vector<8x128xf32>
    %30 = arith.mulf %28, %29 : vector<8x128xf32>
    %31 = arith.addf %21, %30 : vector<8x128xf32>
    %c3 = arith.constant 3 : index
    %c0_14 = arith.constant 0 : index
    %32 = vector.load %arg2[%c3, %c0_14] : memref<4x128xf32, #tpu.memory_space<vmem>>, vector<1x128xf32>
    %c3_15 = arith.constant 3 : index
    %c0_16 = arith.constant 0 : index
    %33 = vector.load %arg3[%c3_15, %c0_16] : memref<4x128xf32, #tpu.memory_space<vmem>>, vector<1x128xf32>
    %34 = vector.broadcast %32 : vector<1x128xf32> to vector<8x128xf32>
    %35 = arith.mulf %0, %34 : vector<8x128xf32>
    %cst_17 = arith.constant dense<0.000000e+00> : vector<8xf32>
    %36 = vector.multi_reduction <add>, %35, %cst_17 [1] : vector<8x128xf32> to vector<8xf32>
    %37 = vector.shape_cast %36 : vector<8xf32> to vector<8x1xf32>
    %38 = vector.broadcast %37 : vector<8x1xf32> to vector<8x128xf32>
    %39 = vector.broadcast %33 : vector<1x128xf32> to vector<8x128xf32>
    %40 = arith.mulf %38, %39 : vector<8x128xf32>
    %41 = arith.addf %31, %40 : vector<8x128xf32>
    %42 = arith.addf %0, %41 : vector<8x128xf32>
    %c0_18 = arith.constant 0 : index
    %c0_19 = arith.constant 0 : index
    %43 = vector.load %arg4[%c0_18, %c0_19] : memref<8x128xf32, #tpu.memory_space<vmem>>, vector<8x128xf32>
    tpu.vector_store %arg4[%c0_18, %c0_19], %42 {strides = array<i32>} : memref<8x128xf32, #tpu.memory_space<vmem>>, vector<8x128xf32>,
    return
  }
  func.func @transform_0(%arg0: i32) -> (i32, i32) {
    %c0_i32 = arith.constant 0 : i32
    %c0_i32_0 = arith.constant 0 : i32
    return %arg0, %c0_i32 : i32, i32
  }
  func.func @transform_1(%arg0: i32) -> (i32, i32) {
    %c0_i32 = arith.constant 0 : i32
    %c0_i32_0 = arith.constant 0 : i32
    %c0_i32_1 = arith.constant 0 : i32
    return %c0_i32, %c0_i32_0 : i32, i32
  }
  func.func @transform_2(%arg0: i32) -> (i32, i32) {
    %c0_i32 = arith.constant 0 : i32
    %c0_i32_0 = arith.constant 0 : i32
    %c0_i32_1 = arith.constant 0 : i32
    return %c0_i32, %c0_i32_0 : i32, i32
  }
  func.func @transform_3(%arg0: i32) -> (i32, i32) {
    %c0_i32 = arith.constant 0 : i32
    %c0_i32_0 = arith.constant 0 : i32
    return %arg0, %c0_i32 : i32, i32
  }
}

</mosaic_0001>

<bundles_post_ra>
// kernel: tpu_custom_call.1
= control target key start
LH: loop header
LB: loop body
LE: loop exit
PB: predicated region body
PF: predicated region fallthrough
CT: control target
= control target key end

     0   :  { %8 = vsyncpa [#allocation3], 0  ;;  %s781_s0 = inlined_call_operand.hbm [shape: f32[16,128], index: 0, kind: input, shape index: {}]   ;;  %s782_s1 = inlined_call_operand.hbm [shape: f32[4,128], index: 1, kind: input, shape index: {}]   ;;  %s783_s2 = inlined_call_operand.hbm [shape: f32[4,128], index: 2, kind: input, shape index: {}]   ;;  %s784_s3 = inlined_call_operand.hbm [shape: f32[16,128], index: 3, kind: output, shape index: {}]  }
   0x1   :  { %10 = vsyncpa [#allocation3 + $0x1], 0 }
   0x2   :  { %11 = vsyncpa [#allocation6], 0 }
   0x3   :  { %12 = vsyncpa [#allocation4], 0 }
   0x4   :  { %14 = vsyncpa [#allocation4 + $0x1], 0  ;;  %s636_s12 = smov 0   ;;  %s638_s13 = smov 0  }
   0x5   :  { %s640_s14 = smov 0   ;;  %s642_s15 = smov 0  }
   0x6 LB: > { %s657_s16 = sadd.s32 4294967295, %s612_s15   ;;  %s361_s17 = sadd.s32 4294967294, %s612_s15   ;;  %s612_s15 = sphi %s642_s15, %s794_s15   ;;  %s608_s14 = sphi %s640_s14, %s793_s14   ;;  %s604_s13 = sphi %s638_s13, %s792_s13   ;;  %s600_s12 = sphi %s636_s12, %s791_s12  }
   0x7   : > { %p40_p0 = scmp.ne.s32.totalorder %s604_s13, %s600_s12  ;;  %p41_p1 = scmp.eq.s32.totalorder %s657_s16, 0 }
   0x8   : > { %p106_p2 = scmp.eq.s32.totalorder %s657_s16, 1  ;;  %p112_p3 = scmp.eq.s32.totalorder %s361_s17, 1 }
   0x9   : > { %p666_p4 = por %p41_p1, %p40_p0  ;;  %p362_p5 = scmp.ge.s32.totalorder %s612_s15, 1 }
   0xa   : > { %p671_p6 = por %p112_p3, %p40_p0  ;;  %p119_p7 = scmp.lt.s32.totalorder %s612_s15, 3 }
   0xb   : > { %s131_s22 = sshll.u32 %s782_s1, 4  ;;  %s614_s24 = smov [#allocation5]   ;;  %s132_s22 = int_to_ptr.hbm [resolvable:$true] %s131_s22 }
   0xc   : > { %p679_p8 = pnand %p362_p5, %p119_p7  ;;  %s133_s25 = sshll.u32 %s614_s24, 4  ;;  %s134_s25 = int_to_ptr.vmem [resolvable:$true] %s133_s25 }
   0xd   : > { %s143_s28 = sshll.u32 %s783_s2, 4  ;;  %s615_s29 = smov [#allocation7]   ;;  %s144_s28 = int_to_ptr.hbm [resolvable:$true] %s143_s28 }
   0xe   : > { %p389_p10 = pneg %p679_p8  ;;  %s145_s30 = sshll.u32 %s615_s29, 4  ;;  %s146_s30 = int_to_ptr.vmem [resolvable:$true] %s145_s30 }
   0xf   : > { %s692_s4 = sadd.s32 1, %s612_s15   ;;  %s27_s5 = sadd.s32 1, %s608_s14 }
  0x10   : > { %p390_p11 = pnand %p389_p10, %p41_p1  ;;  %s24_s6 = ssub.s32 %s612_s15, %s692_s4 }
  0x11   : > { %p34_p12 = scmp.ne.s32.totalorder %s608_s14, %s604_s13  ;;  %p25_p13 = scmp.eq.s32.totalorder %s24_s6, 0 }
  0x12   : > { %392 = dma.hbm_to_vmem [thread:$0]  (!%p390_p11), %s132_s22, 64, %s134_s25, [#allocation6]  }
  0x13   : > { %395 = dma.hbm_to_vmem [thread:$0]  (!%p390_p11), %s144_s28, 64, %s146_s30, [#allocation6]  }
  0x14   : > { %p35_p0 = scmp.eq.s32.totalorder %s612_s15, 0  ;;  %p702_p3 = por %p106_p2, %p34_p12 }
  0x15   : > { %p406_p5 = scmp.lt.s32.totalorder %s612_s15, 2  ;;  %s156_s9 = sand.u32 1, %s608_s14  }
  0x16   : > { %s708_s8 = scalar_select %p25_p13, %s608_s14, %s27_s5  }
  0x17   : > { %p36_p7 = por %p35_p0, %p34_p12  ;;  %s366_s10 = sshll.u32 %s156_s9, 3 }
  0x18   : > { %s367_s11 = sshll.u32 %s612_s15, 3  ;;  %s160_s22 = scalar_lea.vmem [#allocation2], %s366_s10 }
  0x19   : > { %s164_s21 = scalar_lea.hbm %s781_s0, %s367_s11  ;;  %s168_s24 = sshll.u32 %s160_s22, 4  ;;  %s169_s24 = int_to_ptr.vmem [resolvable:$true] %s168_s24 }
  0x1a   : > { %s166_s25 = sshll.u32 %s164_s21, 4  ;;  %p715_p2 = pnand %p406_p5, %p36_p7  ;;  %s167_s25 = int_to_ptr.hbm [resolvable:$true] %s166_s25 }
  0x1b   : > { %s157_s27 = scalar_lea.sflag [#allocation3], %s156_s9  ;;  %s512_s28 = sshra.s32 %s167_s25, 4  ;;  %s513_s28 = int_to_ptr.hbm [resolvable:$true] %s512_s28 }
  0x1c   : > { %s514_s29 = scalar_lea.hbm %s513_s28, 8  ;;  %p516_p11 = pneg %p715_p2 }
  0x1d   : > { %p515_p10 = scmp.ne.s32.totalorder %s513_s28, %s514_s29  ;;  %s519_s6 = scalar_lea.hbm %s781_s0, 16 }
  0x1e   : > { %p520_p0 = scmp.lt.s32.totalorder %s513_s28, %s781_s0  ;;  %p521_p5 = scmp.lt.s32.totalorder %s519_s6, %s514_s29 }
  0x1f   : > { %p517_p12 = pnand %p516_p11, %p515_p10 }
  0x20   : > { %p522_p7 = por %p521_p5, %p520_p0 }
  0x21   : > { %p518_p13 = pneg %p517_p12 }
  0x23   : > { %p523_p9 = pnand %p522_p7, %p518_p13 }
  0x25   : > { %526 = shalt.err (!%p523_p9)
}
  0x26   : > { %399 = dma.hbm_to_vmem [thread:$0]  (!%p715_p2), %s167_s25, 128, %s169_s24, %s157_s27  }
  0x27   : > { %177 = sbr.rel (%p679_p8) target bundleno = 187 (0xbb), region = 32  ;;  %s732_s9 = sand.u32 (!%p679_p8), 1, %s604_s13  }
  0x28   : > { %s369_s17 = sshll.u32 (!%p679_p8), %s732_s9, 3  ;;  %s180_s20 = scalar_lea.sflag (!%p679_p8), [#allocation3], %s732_s9 }
  0x29   : > { %s183_s21 = scalar_lea.vmem (!%p679_p8), [#allocation2], %s369_s17 }
  0x2c   : > { %587 = dma.done.wait (%p666_p4), %s180_s20, 128  }
  0x2d   : > { %589 = vsyncadd (%p666_p4), %s180_s20, 4294967168 }
  0x2e   : > { %591 = dma.done.wait (%p41_p1), [#allocation6], 128  }
  0x2f   : > { %593 = vsyncadd (%p41_p1), [#allocation6], 4294967168  ;;  %v217_v0 = vld [vmem:[%s183_s21] sm:$0xff]  ;;  %v444_v1 = vld [vmem:[#allocation5] ss:$0 sm:$0xff]  ;;  %s374_s18 = sshll.u32 %s657_s16, 3 }
  0x30   : > { %v445_v2 = vld [vmem:[#allocation5 + $0x2] ss:$0 sm:$0xff]  ;;  %v221_v3 = vmul.f32 %v444_v1, %v217_v0  ;;  %v446_v5 = vld [vmem:[#allocation5 + $0x1] ss:$0 sm:$0xff]  ;;  %v447_v6 = vld [vmem:[#allocation5 + $0x3] ss:$0 sm:$0xff]  ;;  %s267_s24 = scalar_lea.hbm %s784_s3, %s374_s18 }
  0x31   : > { %v239_v4 = vmul.f32 %v445_v2, %v217_v0  ;;  %v230_v7 = vmul.f32 %v446_v5, %v217_v0  ;;  %v248_v8 = vmul.f32 %v447_v6, %v217_v0  ;;  %v448_v11 = vld [vmem:[#allocation7] ss:$0 sm:$0xff]  ;;  %v450_v12 = vld [vmem:[#allocation7 + $0x1] ss:$0 sm:$0xff]  ;;  %v449_v13 = vld [vmem:[#allocation7 + $0x2] ss:$0 sm:$0xff] }
  0x32   : > { %222 = vadd.xlane.f32.xlu0 %v221_v3  ;;  %v451_v14 = vld [vmem:[#allocation7 + $0x3] ss:$0 sm:$0xff]  ;;  %s216_s25 = scalar_lea.vmem [#allocation8], %s369_s17  ;;  %s271_s27 = sshll.u32 %s267_s24, 4  ;;  %s272_s27 = int_to_ptr.hbm [resolvable:$true] %s271_s27 }
  0x33   : > { %240 = vadd.xlane.f32.xlu1 %v239_v4  ;;  %s269_s26 = sshll.u32 %s216_s25, 4  ;;  %s257_s16 = scalar_lea.sflag [#allocation4], %s732_s9  ;;  %s270_s26 = int_to_ptr.vmem [resolvable:$true] %s269_s26 }
  0x34   : > { %s556_s28 = sshra.s32 %s272_s27, 4  ;;  %s562_s6 = scalar_lea.hbm %s784_s3, 16  ;;  %s557_s28 = int_to_ptr.hbm [resolvable:$true] %s556_s28 }
  0x35   : > { %s558_s29 = scalar_lea.hbm %s557_s28, 8  ;;  %p563_p9 = scmp.lt.s32.totalorder %s557_s28, %s784_s3 }
  0x36   : > { %p559_p1 = scmp.ne.s32.totalorder %s557_s28, %s558_s29  ;;  %p564_p2 = scmp.lt.s32.totalorder %s562_s6, %s558_s29 }
  0x38   : > { %p560_p4 = pnand %p559_p1, %p702_p3  ;;  %p565_p10 = por %p564_p2, %p563_p9 }
  0x3a   : > { %231 = vadd.xlane.f32.xlu0 %v230_v7  ;;  %p561_p8 = pneg %p560_p4 }
  0x3b   : > { %249 = vadd.xlane.f32.xlu1 %v248_v8 }
  0x3c   : > { %p566_p11 = pnand %p565_p10, %p561_p8 }
  0xa5   : > { %v223_v9 = vpop.xlane.xlu0 %222 }
  0xa6   : > { %v241_v10 = vpop.xlane.xlu1 %240  ;;  %v225_v16 = vmul.f32 %v448_v11, %v223_v9 }
  0xa7   : > { %v243_v19 = vmul.f32 %v449_v13, %v241_v10 }
  0xad   : > { %v232_v15 = vpop.xlane.xlu0 %231 }
  0xae   : > { %v234_v17 = vmul.f32 %v450_v12, %v232_v15  ;;  %v250_v18 = vpop.xlane.xlu1 %249 }
  0xaf   : > { %v252_v21 = vmul.f32 %v451_v14, %v250_v18 }
  0xb0   : > { %v235_v20 = vadd.f32 %v234_v17, %v225_v16 }
  0xb2   : > { %v244_v22 = vadd.f32 %v243_v19, %v235_v20 }
  0xb4   : > { %v253_v23 = vadd.f32 %v252_v21, %v244_v22 }
  0xb6   : > { %v254_v24 = vadd.f32 %v253_v23, %v217_v0 }
  0xb8   : > { %255 = vst [vmem:[%s216_s25] sm:$0xff] %v254_v24 }
  0xb9   : > { %569 = shalt.err (!%p566_p11)
}
  0xba   : > { %387 = dma.vmem_to_hbm [thread:$0]  (%p702_p3), %s270_s26, 128, %s272_s27, %s257_s16  }
  0xbb PF: > { %s283_s9 = sand.u32 1, %s600_s12   ;;  %p790_p12 = scmp.ge.s32.totalorder %s612_s15, 2 }
  0xbc   : > { %s284_s17 = scalar_lea.sflag [#allocation4], %s283_s9 }
  0xbd   : > { %p401_p13 = pnand %p790_p12, %p671_p6 }
  0xbf   : > { %p402_p0 = pneg %p401_p13 }
  0xc1   : > { %595 = dma.done.wait (%p402_p0), %s284_s17, 128  }
  0xc2   : > { %597 = vsyncadd (%p402_p0), %s284_s17, 4294967168  ;;  %p17_p5 = scmp.ge.s32.totalorder %s692_s4, 4   ;;  %s791_s12 = smov %s604_s13 }
  0xc3   : > { %s792_s13 = smov %s608_s14  ;;  %s793_s14 = smov %s708_s8 }
  0xc4   : > { %s794_s15 = smov %s692_s4  ;;  %19 = sbr.rel (!%p17_p5) target bundleno = 6 (0x6), region = 85 }
  0xc9   :  { %290 = vsyncpa [#allocation3], 1 }
  0xca   :  { %292 = vsyncpa [#allocation3 + $0x1], 1 }
  0xcb   :  { %293 = vsyncpa [#allocation6], 1 }
  0xcc   :  { %294 = vsyncpa [#allocation4], 1 }
  0xcd   :  { %296 = vsyncpa [#allocation4 + $0x1], 1 }

</bundles_post_ra>
